<compile_context>
chip_gen: v7x
topology: tpu7x:2x2x1
jax: 0.10.0
libtpu: 0.0.40
codegen_flags: <defaults>
</compile_context>

<pallas_src>
import math

import jax
import jax.numpy as jnp
from jax import lax
from jax.experimental import pallas as pl
from jax.experimental.pallas import tpu as pltpu


def _flatten_head_kernel(x_ref, w_ref, b_ref, o_ref, acc_ref):
    """Grid = (var_block i, batch_block b, nf_block k); k innermost (reduction axis).

    x_ref:   (tb, nv_blk, tk)   flattened per-var features (d_model-major)
    w_ref:   (nv_blk, T, tk)    native nn.Linear weight layout (contracted on last axes)
    b_ref:   (1, nv_blk * T)    per-var biases, lane-concatenated (resident over b, k)
    o_ref:   (tb, nv_blk * T)   lane-dense output slab (written once, at k == last)
    acc_ref: (tb, nv_blk * T)   f32 VMEM accumulator scratch
    """
    k = pl.program_id(2)
    nk = pl.num_programs(2)
    nv_blk, T = w_ref.shape[0], w_ref.shape[1]

    @pl.when(k == 0)
    def _():
        acc_ref[...] = jnp.zeros_like(acc_ref)

    # Weight-DMA bound: do not pad/pack to raise MXU utilization of these small matmuls.
    for v in range(nv_blk):                       # static unroll; nv_blk is small
        z = x_ref[:, v, :]                        # (tb, tk): load only what this push needs
        w = w_ref[v]                              # (T, tk)
        acc_ref[:, v * T:(v + 1) * T] += lax.dot_general(
            z, w,
            dimension_numbers=(((1,), (1,)), ((), ())),   # z @ w.T, no transpose copy
            preferred_element_type=jnp.float32,
        )

    @pl.when(k == nk - 1)
    def _():
        o_ref[...] = (acc_ref[...] + b_ref[...].astype(jnp.float32)).astype(o_ref.dtype)


def _min_sublane(itemsize):
    # dtype-aware second-to-last-dim tile: (8,128) f32 / (16,128) bf16 / (32,128) int8-fp8
    return {4: 8, 2: 16, 1: 32}.get(itemsize, 8)


def _vmem_budgets():
    """(soft tiling budget, vmem_limit_bytes) sized per TPU generation."""
    phys = 64 << 20                               # conservative fallback = v7x per-TC VMEM
    try:
        info = pltpu.get_tpu_info()
        phys = int(getattr(info, "vmem_capacity_bytes", phys)) or phys
    except Exception:
        pass
    return int(0.60 * phys), int(0.72 * phys)


def _divisors_desc(n):
    return [d for d in range(n, 0, -1) if n % d == 0]


def _pick_tiling(B, n_vars, nf, T, x_isz, w_isz, b_isz, budget_bytes):
    """Largest (tb, nv_blk, tk) whose double-buffered per-step footprint fits the budget.

    Preference: keep all variables together and the full nf contraction (weights streamed
    exactly once, resident across batch blocks), then shrink the batch block, then tile nf.
    """
    sub_x = _min_sublane(x_isz)
    sub_o = _min_sublane(x_isz)                   # output dtype == x dtype

    def footprint(tb, nv, tk):
        x_b = tb * nv * tk * x_isz
        w_b = nv * T * tk * w_isz
        bias_b = nv * T * b_isz
        out_b = tb * nv * T * x_isz
        acc_b = tb * nv * T * 4
        return 2 * (x_b + w_b + bias_b + out_b) + acc_b   # 2x: BlockSpec double-buffering

    nv_cands = [nv for nv in _divisors_desc(n_vars)
                if nv == n_vars or (nv % sub_x == 0 and (nv * T) % 128 == 0)]
    tb_cands = [tb for tb in _divisors_desc(B) if tb == B or tb % sub_o == 0]
    tk_cands = [tk for tk in _divisors_desc(nf) if tk == nf or tk % 128 == 0]

    for nv in nv_cands:
        for tk in tk_cands:                        # tk == nf first: no reduction re-streaming
            for tb in tb_cands:
                if footprint(tb, nv, tk) <= budget_bytes:
                    return tb, nv, tk
    # Nothing fits the soft budget: take the smallest legal tiling and rely on the raised
    # vmem_limit_bytes (better than raising on odd PatchTST configs, e.g. n_vars=7, T=720).
    # TODO(synk): consider pl.Buffered(3) on the weight BlockSpec if DMA latency is exposed.
    return tb_cands[-1], nv_cands[-1], tk_cands[-1]


def flatten_head_forward(x, weights, biases):
    """
    x:       [B, n_vars, d_model, patch_num]
    weights: [n_vars, target_window, nf]   (native PyTorch nn.Linear layout)
    biases:  [n_vars, target_window]
    returns: [B, n_vars, target_window]
    """
    B, n_vars, d_model, patch_num = x.shape
    nf = d_model * patch_num
    T = weights.shape[1]
    assert weights.shape == (n_vars, T, nf)
    assert biases.shape == (n_vars, T)

    # Contiguous views only — no HBM transposes/copies on either side of the kernel.
    x_flat = x.reshape(B, n_vars, nf)              # == per-var flatten(start_dim=-2)
    b_flat = biases.reshape(1, n_vars * T)

    budget, vmem_limit = _vmem_budgets()
    tb, nv_blk, tk = _pick_tiling(B, n_vars, nf, T,
                                  x.dtype.itemsize, weights.dtype.itemsize,
                                  biases.dtype.itemsize, budget)
    grid = (n_vars // nv_blk, B // tb, nf // tk)

    cost = pl.CostEstimate(
        flops=2 * B * n_vars * T * nf,
        bytes_accessed=(n_vars * T * nf * weights.dtype.itemsize
                        + B * n_vars * nf * x.dtype.itemsize
                        + n_vars * T * biases.dtype.itemsize
                        + B * n_vars * T * x.dtype.itemsize),
        transcendentals=0,
    )

    out = pl.pallas_call(
        _flatten_head_kernel,
        out_shape=jax.ShapeDtypeStruct((B, n_vars * T), x.dtype),
        grid_spec=pltpu.PrefetchScalarGridSpec(
            num_scalar_prefetch=0,
            grid=grid,
            in_specs=[
                pl.BlockSpec((tb, nv_blk, tk), lambda i, b, k: (b, i, k)),
                pl.BlockSpec((nv_blk, T, tk), lambda i, b, k: (i, 0, k)),  # resident over b
                pl.BlockSpec((1, nv_blk * T), lambda i, b, k: (0, i)),     # resident over b,k
            ],
            out_specs=pl.BlockSpec((tb, nv_blk * T), lambda i, b, k: (b, i)),
            scratch_shapes=[pltpu.VMEM((tb, nv_blk * T), jnp.float32)],
        ),
        compiler_params=pltpu.CompilerParams(
            # b is the real megacore lever on v7x (i collapses to 1 when nv_blk == n_vars);
            # k is the reduction axis and must stay "arbitrary".
            dimension_semantics=("parallel", "parallel", "arbitrary"),
            vmem_limit_bytes=vmem_limit,
        ),
        cost_estimate=cost,
    )(x_flat, weights, b_flat)

    # Contiguous view back to [B, n_vars, T] (matches torch.stack(x_out, dim=1)).
    return out.reshape(B, n_vars, T)


def make_params(key, n_vars, target_window, nf, dtype=jnp.float32):
    """Deterministic kaiming_normal_ weights (fan_in mode, std = sqrt(2/nf)), zero bias."""
    std = math.sqrt(2.0 / nf)
    w = jax.random.normal(key, (n_vars, target_window, nf), dtype=dtype) * std
    b = jnp.zeros((n_vars, target_window), dtype=dtype)
    return w, b


if __name__ == "__main__":
    # Small config consistent with the module's __init__:
    #   enc_in (n_vars)=4, window_size (context & target)=16, d_model=32,
    #   patch_len=4, stride=4, padding_patch='end'
    #   -> patch_num = (16-4)//4 + 1 + 1 = 5, nf = 32*5 = 160
    B = 2
    n_vars = 4
    d_model = 32
    patch_num = 5
    target_window = 16
    nf = d_model * patch_num

    key = jax.random.PRNGKey(0)
    kx, kw = jax.random.split(key)

    x = jax.random.normal(kx, (B, n_vars, d_model, patch_num), dtype=jnp.float32)
    weights, biases = make_params(kw, n_vars, target_window, nf)

    # NOTE: head_dropout is identity in eval mode; no dropout applied in the kernel.
    # NOTE: for production shapes, pass x/weights as bf16 — the op is HBM-bound, ~2x faster.
    out = flatten_head_forward(x, weights, biases)
    out = jax.block_until_ready(out)

    # Pure-JAX reference check of the same semantics.
    z_ref = x.reshape(B, n_vars, nf)                                   # flatten(start_dim=-2)
    ref = jnp.einsum("bik,itk->bit", z_ref, weights) + biases[None, :, :]
    assert out.shape == (B, n_vars, target_window)
    assert jnp.allclose(out, ref, atol=1e-4, rtol=1e-4)

    print("KERNEL_OK")
</pallas_src>

<mosaic_0001>
module attributes {stable_mosaic.version = 11 : i64} {
  func.func @_flatten_head_kernel(%arg0: i32, %arg1: i32, %arg2: i32, %arg3: memref<2x4x160xf32, #tpu.memory_space<vmem>>, %arg4: memref<4x16x160xf32, #tpu.memory_space<vmem>>, %arg5: memref<1x64xf32, #tpu.memory_space<vmem>>, %arg6: memref<2x64xf32, #tpu.memory_space<vmem>>, %arg7: memref<2x64xf32, #tpu.memory_space<vmem>>) attributes {dimension_semantics = [#tpu.dimension_semantics<parallel>, #tpu.dimension_semantics<parallel>, #tpu.dimension_semantics<arbitrary>], iteration_bounds = array<i64: 1, 1, 1>, scalar_prefetch = 0 : i64, scratch_operands = 1 : i64, tpu.core_type = #tpu.core_type<tc>, window_params = [{transform_indices = @transform_0, window_bounds = array<i64: 2, 4, 160>}, {transform_indices = @transform_1, window_bounds = array<i64: 4, 16, 160>}, {transform_indices = @transform_2, window_bounds = array<i64: 1, 64>}, {transform_indices = @transform_3, window_bounds = array<i64: 2, 64>}]} {
    %c0_i32 = arith.constant 0 : i32
    %0 = arith.cmpi eq, %arg2, %c0_i32 : i32
    %1 = arith.extui %0 : i1 to i32
    %c0_i32_0 = arith.constant 0 : i32
    %2 = arith.cmpi ne, %1, %c0_i32_0 : i32
    scf.if %2 {
      %cst_39 = arith.constant 0.000000e+00 : f32
      %38 = vector.broadcast %cst_39 : f32 to vector<2x64xf32>
      %c0_40 = arith.constant 0 : index
      %c0_41 = arith.constant 0 : index
      %39 = vector.load %arg7[%c0_40, %c0_41] : memref<2x64xf32, #tpu.memory_space<vmem>>, vector<2x64xf32>
      tpu.vector_store %arg7[%c0_40, %c0_41], %38 {strides = array<i32>} : memref<2x64xf32, #tpu.memory_space<vmem>>, vector<2x64xf32>,
    } else {
    }
    %c0 = arith.constant 0 : index
    %c0_1 = arith.constant 0 : index
    %c0_2 = arith.constant 0 : index
    %3 = vector.load %arg3[%c0, %c0_1, %c0_2] : memref<2x4x160xf32, #tpu.memory_space<vmem>>, vector<2x1x160xf32>
    %4 = vector.shape_cast %3 : vector<2x1x160xf32> to vector<2x160xf32>
    %c0_3 = arith.constant 0 : index
    %c0_4 = arith.constant 0 : index
    %c0_5 = arith.constant 0 : index
    %5 = vector.load %arg4[%c0_3, %c0_4, %c0_5] : memref<4x16x160xf32, #tpu.memory_space<vmem>>, vector<1x16x160xf32>
    %6 = vector.shape_cast %5 : vector<1x16x160xf32> to vector<16x160xf32>
    %c0_6 = arith.constant 0 : index
    %c0_7 = arith.constant 0 : index
    %7 = vector.load %arg7[%c0_6, %c0_7] : memref<2x64xf32, #tpu.memory_space<vmem>>, vector<2x16xf32>
    %cst = arith.constant dense<0.000000e+00> : vector<2x16xf32>
    %8 = tpu.matmul %4, %6, %cst {dimension_numbers = #tpu.dot_dimension_numbers<[1], [1], [0], [0], [0, 0, 1, 0], [], []>} : vector<2x160xf32>, vector<16x160xf32>, vector<2x16xf32> -> vector<2x16xf32>
    %9 = arith.addf %7, %8 : vector<2x16xf32>
    %c0_8 = arith.constant 0 : index
    %c0_9 = arith.constant 0 : index
    %10 = vector.load %arg7[%c0_8, %c0_9] : memref<2x64xf32, #tpu.memory_space<vmem>>, vector<2x16xf32>
    tpu.vector_store %arg7[%c0_8, %c0_9], %9 {strides = array<i32>} : memref<2x64xf32, #tpu.memory_space<vmem>>, vector<2x16xf32>,
    %c0_10 = arith.constant 0 : index
    %c1 = arith.constant 1 : index
    %c0_11 = arith.constant 0 : index
    %11 = vector.load %arg3[%c0_10, %c1, %c0_11] : memref<2x4x160xf32, #tpu.memory_space<vmem>>, vector<2x1x160xf32>
    %12 = vector.shape_cast %11 : vector<2x1x160xf32> to vector<2x160xf32>
    %c1_12 = arith.constant 1 : index
    %c0_13 = arith.constant 0 : index
    %c0_14 = arith.constant 0 : index
    %13 = vector.load %arg4[%c1_12, %c0_13, %c0_14] : memref<4x16x160xf32, #tpu.memory_space<vmem>>, vector<1x16x160xf32>
    %14 = vector.shape_cast %13 : vector<1x16x160xf32> to vector<16x160xf32>
    %c0_15 = arith.constant 0 : index
    %c16 = arith.constant 16 : index
    %15 = vector.load %arg7[%c0_15, %c16] : memref<2x64xf32, #tpu.memory_space<vmem>>, vector<2x16xf32>
    %cst_16 = arith.constant dense<0.000000e+00> : vector<2x16xf32>
    %16 = tpu.matmul %12, %14, %cst_16 {dimension_numbers = #tpu.dot_dimension_numbers<[1], [1], [0], [0], [0, 0, 1, 0], [], []>} : vector<2x160xf32>, vector<16x160xf32>, vector<2x16xf32> -> vector<2x16xf32>
    %17 = arith.addf %15, %16 : vector<2x16xf32>
    %c0_17 = arith.constant 0 : index
    %c16_18 = arith.constant 16 : index
    %18 = vector.load %arg7[%c0_17, %c16_18] : memref<2x64xf32, #tpu.memory_space<vmem>>, vector<2x16xf32>
    tpu.vector_store %arg7[%c0_17, %c16_18], %17 {strides = array<i32>} : memref<2x64xf32, #tpu.memory_space<vmem>>, vector<2x16xf32>,
    %c0_19 = arith.constant 0 : index
    %c2 = arith.constant 2 : index
    %c0_20 = arith.constant 0 : index
    %19 = vector.load %arg3[%c0_19, %c2, %c0_20] : memref<2x4x160xf32, #tpu.memory_space<vmem>>, vector<2x1x160xf32>
    %20 = vector.shape_cast %19 : vector<2x1x160xf32> to vector<2x160xf32>
    %c2_21 = arith.constant 2 : index
    %c0_22 = arith.constant 0 : index
    %c0_23 = arith.constant 0 : index
    %21 = vector.load %arg4[%c2_21, %c0_22, %c0_23] : memref<4x16x160xf32, #tpu.memory_space<vmem>>, vector<1x16x160xf32>
    %22 = vector.shape_cast %21 : vector<1x16x160xf32> to vector<16x160xf32>
    %c0_24 = arith.constant 0 : index
    %c32 = arith.constant 32 : index
    %23 = vector.load %arg7[%c0_24, %c32] : memref<2x64xf32, #tpu.memory_space<vmem>>, vector<2x16xf32>
    %cst_25 = arith.constant dense<0.000000e+00> : vector<2x16xf32>
    %24 = tpu.matmul %20, %22, %cst_25 {dimension_numbers = #tpu.dot_dimension_numbers<[1], [1], [0], [0], [0, 0, 1, 0], [], []>} : vector<2x160xf32>, vector<16x160xf32>, vector<2x16xf32> -> vector<2x16xf32>
    %25 = arith.addf %23, %24 : vector<2x16xf32>
    %c0_26 = arith.constant 0 : index
    %c32_27 = arith.constant 32 : index
    %26 = vector.load %arg7[%c0_26, %c32_27] : memref<2x64xf32, #tpu.memory_space<vmem>>, vector<2x16xf32>
    tpu.vector_store %arg7[%c0_26, %c32_27], %25 {strides = array<i32>} : memref<2x64xf32, #tpu.memory_space<vmem>>, vector<2x16xf32>,
    %c0_28 = arith.constant 0 : index
    %c3 = arith.constant 3 : index
    %c0_29 = arith.constant 0 : index
    %27 = vector.load %arg3[%c0_28, %c3, %c0_29] : memref<2x4x160xf32, #tpu.memory_space<vmem>>, vector<2x1x160xf32>
    %28 = vector.shape_cast %27 : vector<2x1x160xf32> to vector<2x160xf32>
    %c3_30 = arith.constant 3 : index
    %c0_31 = arith.constant 0 : index
    %c0_32 = arith.constant 0 : index
    %29 = vector.load %arg4[%c3_30, %c0_31, %c0_32] : memref<4x16x160xf32, #tpu.memory_space<vmem>>, vector<1x16x160xf32>
    %30 = vector.shape_cast %29 : vector<1x16x160xf32> to vector<16x160xf32>
    %c0_33 = arith.constant 0 : index
    %c48 = arith.constant 48 : index
    %31 = vector.load %arg7[%c0_33, %c48] : memref<2x64xf32, #tpu.memory_space<vmem>>, vector<2x16xf32>
    %cst_34 = arith.constant dense<0.000000e+00> : vector<2x16xf32>
    %32 = tpu.matmul %28, %30, %cst_34 {dimension_numbers = #tpu.dot_dimension_numbers<[1], [1], [0], [0], [0, 0, 1, 0], [], []>} : vector<2x160xf32>, vector<16x160xf32>, vector<2x16xf32> -> vector<2x16xf32>
    %33 = arith.addf %31, %32 : vector<2x16xf32>
    %c0_35 = arith.constant 0 : index
    %c48_36 = arith.constant 48 : index
    %34 = vector.load %arg7[%c0_35, %c48_36] : memref<2x64xf32, #tpu.memory_space<vmem>>, vector<2x16xf32>
    tpu.vector_store %arg7[%c0_35, %c48_36], %33 {strides = array<i32>} : memref<2x64xf32, #tpu.memory_space<vmem>>, vector<2x16xf32>,
    %c0_i32_37 = arith.constant 0 : i32
    %35 = arith.cmpi eq, %arg2, %c0_i32_37 : i32
    %36 = arith.extui %35 : i1 to i32
    %c0_i32_38 = arith.constant 0 : i32
    %37 = arith.cmpi ne, %36, %c0_i32_38 : i32
    scf.if %37 {
      %c0_39 = arith.constant 0 : index
      %c0_40 = arith.constant 0 : index
      %38 = vector.load %arg7[%c0_39, %c0_40] : memref<2x64xf32, #tpu.memory_space<vmem>>, vector<2x64xf32>
      %c0_41 = arith.constant 0 : index
      %c0_42 = arith.constant 0 : index
      %39 = vector.load %arg5[%c0_41, %c0_42] : memref<1x64xf32, #tpu.memory_space<vmem>>, vector<1x64xf32>
      %40 = vector.broadcast %39 : vector<1x64xf32> to vector<2x64xf32>
      %41 = arith.addf %38, %40 : vector<2x64xf32>
      %c0_43 = arith.constant 0 : index
      %c0_44 = arith.constant 0 : index
      %42 = vector.load %arg6[%c0_43, %c0_44] : memref<2x64xf32, #tpu.memory_space<vmem>>, vector<2x64xf32>
      tpu.vector_store %arg6[%c0_43, %c0_44], %41 {strides = array<i32>} : memref<2x64xf32, #tpu.memory_space<vmem>>, vector<2x64xf32>,
    } else {
    }
    return
  }
  func.func @transform_0(%arg0: i32, %arg1: i32, %arg2: i32) -> (i32, i32, i32) {
    %c0_i32 = arith.constant 0 : i32
    return %arg1, %arg0, %arg2 : i32, i32, i32
  }
  func.func @transform_1(%arg0: i32, %arg1: i32, %arg2: i32) -> (i32, i32, i32) {
    %c0_i32 = arith.constant 0 : i32
    %c0_i32_0 = arith.constant 0 : i32
    return %arg0, %c0_i32, %arg2 : i32, i32, i32
  }
  func.func @transform_2(%arg0: i32, %arg1: i32, %arg2: i32) -> (i32, i32) {
    %c0_i32 = arith.constant 0 : i32
    %c0_i32_0 = arith.constant 0 : i32
    return %c0_i32, %arg0 : i32, i32
  }
  func.func @transform_3(%arg0: i32, %arg1: i32, %arg2: i32) -> (i32, i32) {
    %c0_i32 = arith.constant 0 : i32
    return %arg1, %arg0 : i32, i32
  }
}

</mosaic_0001>

<bundles_post_ra>
// kernel: tpu_custom_call.1
= control target key start
LH: loop header
LB: loop body
LE: loop exit
PB: predicated region body
PF: predicated region fallthrough
CT: control target
= control target key end

     0   :  { %8 = vsyncpa [#allocation4], 0  ;;  %s766_s0 = inlined_call_operand.hbm [shape: f32[2,4,160], index: 0, kind: input, shape index: {}]   ;;  %s767_s1 = inlined_call_operand.hbm [shape: f32[4,16,160], index: 1, kind: input, shape index: {}]   ;;  %s768_s2 = inlined_call_operand.vmem [shape: f32[1,64], index: 2, kind: input, shape index: {}]   ;;  %s769_s3 = inlined_call_operand.hbm [shape: f32[2,64], index: 3, kind: output, shape index: {}]  }
   0x1   :  { %9 = vsyncpa [#allocation7], 0 }
   0x2   :  { %10 = vsyncpa [#allocation5], 0  ;;  %s674_s12 = smov [#allocation3]   ;;  %s602_s16 = scalar_lea.hbm %s766_s0, 256 }
   0x3   :  { %s16_s13 = sshll.u32 %s674_s12, 4  ;;  %p603_p0 = scmp.ne.s32.totalorder %s766_s0, %s602_s16  ;;  %s17_s13 = int_to_ptr.vmem [resolvable:$true] %s16_s13 }
   0x4   :  { %p606_p1 = scmp.lt.u32.totalorder %s602_s16, %s766_s0 }
   0x6   :  { %p608_p2 = pnand %p606_p1, %p603_p0 }
   0x8   :  { %611 = shalt.err (!%p608_p2)
}
   0x9   :  { %s612_s21 = scalar_lea.vmem %s17_s13, 256  ;;  %p617_p4 = scmp.lt.s32.totalorder %s17_s13, %s17_s13 }
   0xa   :  { %p613_p3 = scmp.ne.s32.totalorder %s17_s13, %s612_s21  ;;  %p618_p5 = scmp.lt.s32.totalorder %s612_s21, %s612_s21 }
   0xc   :  { %p619_p6 = por %p618_p5, %p617_p4 }
   0xe   :  { %p620_p7 = pnand %p619_p6, %p613_p3 }
  0x10   :  { %623 = shalt.err (!%p620_p7)
}
  0x11   :  { %s675_s22 = smov 128   ;;  %s676_s23 = smov 8  }
  0x12   :  { %22 = dma.hbm_to_vmem [thread:$0]  %s766_s0, 256, %s17_s13, [#allocation4], %s675_s22, %s675_s22, %s676_s23  }
  0x13   :  { %s677_s26 = smov [#allocation6]   ;;  %s624_s30 = scalar_lea.hbm %s767_s1, 2048 }
  0x14   :  { %s28_s27 = sshll.u32 %s677_s26, 4  ;;  %p625_p8 = scmp.ne.s32.totalorder %s767_s1, %s624_s30  ;;  %s29_s27 = int_to_ptr.vmem [resolvable:$true] %s28_s27 }
  0x15   :  { %p628_p9 = scmp.lt.u32.totalorder %s624_s30, %s767_s1 }
  0x17   :  { %p630_p10 = pnand %p628_p9, %p625_p8 }
  0x19   :  { %633 = shalt.err (!%p630_p10)
}
  0x1a   :  { %s634_s8 = scalar_lea.vmem %s29_s27, 2048  ;;  %p639_p12 = scmp.lt.s32.totalorder %s29_s27, %s29_s27 }
  0x1b   :  { %p635_p11 = scmp.ne.s32.totalorder %s29_s27, %s634_s8  ;;  %p640_p13 = scmp.lt.s32.totalorder %s634_s8, %s634_s8 }
  0x1d   :  { %p641_p0 = por %p640_p13, %p639_p12 }
  0x1f   :  { %p642_p1 = pnand %p641_p0, %p635_p11 }
  0x21   :  { %645 = shalt.err (!%p642_p1)
}
  0x22   :  { %s678_s0 = smov 256   ;;  %s679_s9 = smov 16  }
  0x23   :  { %34 = dma.hbm_to_vmem [thread:$0]  %s767_s1, 2048, %s29_s27, [#allocation7], %s678_s0, %s678_s0, %s679_s9  }
  0x24   :  { %668 = dma.done.wait [#allocation4], 256  }
  0x25   :  { %669 = vsyncadd [#allocation4], 4294967040 }
  0x26   :  { %670 = dma.done.wait [#allocation7], 2048  }
  0x27   :  { %671 = vsyncadd [#allocation7], 4294965248  ;;  %v680_v0 = vmov 1966171168   ;;  %v63_v2 = vlaneseq  ;;  %vm83_vm0 = vcmask 261120   ;;  %v171_v6 = vld [vmem:[#allocation6 + $0x28] sm:$0xff] }
  0x28   :  { %v61_v1 = vunpack.c.l.s4 %v680_v0  ;;  %vm732_vm1 = vmpackc.low %vm83_vm0, %vm83_vm0  ;;  %v173_v7 = vld [vmem:[#allocation6 + $0x38] sm:$0xff]  ;;  %v53_v8 = vld [vmem:[#allocation6 + $0x8] sm:$0xff]  ;;  %vm47_vm2 = vcmask 517120   ;;  %v681_v59 = vmov 0.0   ;;  %vm163_vm3 = vcmask 123904   ;;  %s682_s1 = smov 48  }
  0x29   :  { %v64_v4 = vshrl.u32 %v63_v2, 7  ;;  %v576_v9 = vpack.c.bf16 %v173_v7, %v171_v6  ;;  %v55_v10 = vld [vmem:[#allocation6 + $0x18] sm:$0xff]  ;;  %v170_v11 = vld [vmem:[#allocation6 + $0x20] sm:$0xff]  ;;  %v172_v12 = vld [vmem:[#allocation6 + $0x30] sm:$0xff]  ;;  %48 = vst.msk [vmem:[#allocation2] sm:$0x3] %vm47_vm2, %v681_v59 }
  0x2a   :  { %v62_v3 = vunpack.c.0.s8 %v61_v1  ;;  %v571_v13 = vpack.c.bf16 %v55_v10, %v53_v8  ;;  %v579_v14 = vpack.c.bf16 %v172_v12, %v170_v11  ;;  %v52_v15 = vld [vmem:[#allocation6] sm:$0xff]  ;;  %v54_v16 = vld [vmem:[#allocation6 + $0x10] sm:$0xff]  ;;  %v168_v20 = vld [vmem:[#allocation3 + $0x9] ss:$4 sm:$0x3]  ;;  %s683_s12 = smov 32  }
  0x2b   :  { %v166_v18 = vld [vmem:[#allocation3 + $0x1] ss:$4 sm:$0x3]  ;;  %578 = vmatprep.subr.msk.bf16.mxu1 %vm732_vm1, %v576_v9  ;;  %v574_v19 = vpack.c.bf16 %v54_v16, %v52_v15  ;;  %v49_v21 = vld [vmem:[#allocation3] ss:$4 sm:$0x3] }
  0x2c   :  { %v65_v17 = vsub.s32 %v62_v3, %v64_v4  ;;  %573 = vmatprep.subr.msk.bf16.mxu0 %vm732_vm1, %v571_v13  ;;  %580 = vmatpush1.bf16.xpose.msra.mxu1 %v579_v14  ;;  %v177_v22 = vcombine.low %v166_v18, %v168_v20  ;;  %v51_v23 = vld [vmem:[#allocation3 + $0x8] ss:$4 sm:$0x3]  ;;  %v292_v24 = vld [vmem:[#allocation6 + $0x48] sm:$0xff]  ;;  %v412_v36 = vld [vmem:[#allocation6 + $0x60] sm:$0xff]  ;;  %vm284_vm4 = vcmask 255104  }
  0x2d   :  { %v294_v25 = vld [vmem:[#allocation6 + $0x58] sm:$0xff]  ;;  %575 = vmatpush1.bf16.xpose.msra.mxu0 %v574_v19  ;;  %v59_v26 = vcombine.low %v49_v21, %v51_v23  ;;  %v287_v28 = vld [vmem:[#allocation3 + $0x2] ss:$4 sm:$0x3]  ;;  %v413_v31 = vld [vmem:[#allocation6 + $0x68] sm:$0xff]  ;;  %vm405_vm5 = vcmask 386304  }
  0x2e   :  { %v581_v27 = vpack.c.bf16 %v294_v25, %v292_v24  ;;  %v184_v29 = vrot.slane %v177_v22, %v65_v17  ;;  %v289_v30 = vld [vmem:[#allocation3 + $0xa] ss:$4 sm:$0x3]  ;;  %v414_v37 = vld [vmem:[#allocation6 + $0x70] sm:$0xff]  ;;  %v291_v40 = vld [vmem:[#allocation6 + $0x40] sm:$0xff]  ;;  %vm526_vm6 = vcmask 517504  }
  0x2f   :  { %v415_v32 = vld [vmem:[#allocation6 + $0x78] sm:$0xff]  ;;  %v66_v33 = vrot.slane %v59_v26, %v65_v17  ;;  %v298_v34 = vcombine.low %v287_v28, %v289_v30  ;;  %v408_v38 = vld [vmem:[#allocation3 + $0x3] ss:$4 sm:$0x3]  ;;  %v589_v49 = vpack.c.bf16 %v414_v37, %v412_v36  ;;  %v570_v15 = vld [vmem:[%s768_s2] ss:$0 sm:$0xff] }
  0x30   :  { %583 = vmatprep.subr.msk.bf16.mxu0 %vm732_vm1, %v581_v27  ;;  %v586_v35 = vpack.c.bf16 %v415_v32, %v413_v31  ;;  %v185_v39 = vcombine.high %v184_v29, %v184_v29  ;;  %v293_v41 = vld [vmem:[#allocation6 + $0x50] sm:$0xff]  ;;  %v410_v42 = vld [vmem:[#allocation3 + $0xb] ss:$4 sm:$0x3]  ;;  %v192_v43 = vrot.slane %v184_v29, %v65_v17  ;;  %v56_v60 = vld [vmem:[#allocation2] sm:$0x3] }
  0x31   :  { %v67_v44 = vcombine.high %v66_v33, %v66_v33  ;;  %v305_v45 = vrot.slane %v298_v34, %v65_v17  ;;  %v419_v46 = vcombine.low %v408_v38, %v410_v42  ;;  %v74_v48 = vrot.slane %v66_v33, %v65_v17  ;;  %s684_s15 = smov [#allocation8]  }
  0x32   :  { %588 = vmatprep.subr.msk.bf16.mxu1 %vm732_vm1, %v586_v35  ;;  %v199_v47 = vrot.slane %v185_v39, %v65_v17  ;;  %v584_v51 = vpack.c.bf16 %v293_v41, %v291_v40  ;;  %s548_s16 = sshll.u32 %s684_s15, 4  ;;  %s549_s16 = int_to_ptr.vmem [resolvable:$true] %s548_s16 }
  0x33   :  { %v81_v50 = vrot.slane %v67_v44, %v65_v17  ;;  %v306_v52 = vcombine.high %v305_v45, %v305_v45  ;;  %v426_v53 = vrot.slane %v419_v46, %v65_v17  ;;  %v313_v58 = vrot.slane %v305_v45, %v65_v17  ;;  %s646_s17 = scalar_lea.vmem %s549_s16, 32  ;;  %p651_p3 = scmp.lt.s32.totalorder %s549_s16, %s549_s16 }
  0x34   :  { %563 = vmatprep.mubr.msk.f32.mxu1 %vm83_vm0, %v199_v47  ;;  %p647_p2 = scmp.ne.s32.totalorder %s549_s16, %s646_s17  ;;  %p652_p4 = scmp.lt.s32.totalorder %s646_s17, %s646_s17 }
  0x35   :  { %274 = vmatmul.mubr.f32.vlgmr.msra.gmra.mrb[0].mxu1 %v192_v43  ;;  %560 = vmatprep.mubr.msk.f32.mxu0 %vm83_vm0, %v81_v50  ;;  %v320_v54 = vrot.slane %v306_v52, %v65_v17  ;;  %v427_v55 = vcombine.high %v426_v53, %v426_v53  ;;  %v434_v57 = vrot.slane %v426_v53, %v65_v17 }
  0x36   :  { %157 = vmatmul.mubr.f32.vlgmr.msra.gmra.mrb[0].mxu0 %v74_v48  ;;  %590 = vmatpush1.bf16.xpose.msra.mxu1 %v589_v49  ;;  %p653_p5 = por %p652_p4, %p651_p3 }
  0x37   :  { %585 = vmatpush1.bf16.xpose.msra.mxu0 %v584_v51  ;;  %566 = vmatprep.mubr.msk.f32.mxu0 %vm83_vm0, %v320_v54  ;;  %v441_v56 = vrot.slane %v427_v55, %v65_v17 }
  0x38   :  { %p654_p6 = pnand %p653_p5, %p647_p2 }
  0x39   :  { %569 = vmatprep.mubr.msk.f32.mxu1 %vm83_vm0, %v441_v56 }
  0x3d   :  { %516 = vmatmul.mubr.f32.vlgmr.msra.gmra.mrb[2].mxu1 %v434_v57 }
  0x3e   :  { %395 = vmatmul.mubr.f32.vlgmr.msra.gmra.mrb[2].mxu0 %v313_v58 }
 0x108   :  { %v275_v61 = vpop.f32.mrb[0].mxu1 }
 0x109   :  { %280 = vrot.lane.b32.xlu0 %v275_v61, %s679_s9  ;;  %v277_v62 = vpop.f32.mrb[1].mxu1  ;;  %v158_v63 = vpop.f32.mrb[0].mxu0 }
 0x10a   :  { %v162_v0 = vadd.f32 %v158_v63, %v56_v60  ;;  %v160_v1 = vpop.f32.mrb[1].mxu0 }
 0x10c   :  { %164 = vst.msk [vmem:[#allocation2] sm:$0x3] %vm163_vm3, %v162_v0 }
 0x110   :  { %v517_v2 = vpop.f32.mrb[2].mxu1 }
 0x111   :  { %v396_v3 = vpop.f32.mrb[2].mxu0  ;;  %v519_v4 = vpop.f32.mrb[3].mxu1  ;;  %522 = vrot.lane.b32.xlu1 %v517_v2, %s682_s1 }
 0x112   :  { %v398_v5 = vpop.f32.mrb[3].mxu0  ;;  %401 = vrot.lane.b32.xlu0 %v396_v3, %s683_s12 }
 0x113   :  { %v174_v7 = vld [vmem:[#allocation2] sm:$0x3] }
 0x17b   :  { %v281_v6 = vpop.permute.xlu0 %280 }
 0x17c   :  { %v283_v8 = vadd.f32 %v281_v6, %v174_v7 }
 0x17e   :  { %285 = vst.msk [vmem:[#allocation2] sm:$0x3] %vm284_vm4, %v283_v8 }
 0x183   :  { %v523_v12 = vpop.permute.xlu1 %522 }
 0x184   :  { %v402_v9 = vpop.permute.xlu0 %401 }
 0x185   :  { %v295_v10 = vld [vmem:[#allocation2] sm:$0x3] }
 0x186   :  { %v404_v11 = vadd.f32 %v402_v9, %v295_v10 }
 0x188   :  { %406 = vst.msk [vmem:[#allocation2] sm:$0x3] %vm405_vm5, %v404_v11 }
 0x18f   :  { %v416_v13 = vld [vmem:[#allocation2] sm:$0x3] }
 0x190   :  { %v525_v14 = vadd.f32 %v523_v12, %v416_v13 }
 0x192   :  { %527 = vst.msk [vmem:[#allocation2] sm:$0x3] %vm526_vm6, %v525_v14 }
 0x199   :  { %v531_v16 = vld [vmem:[#allocation2] sm:$0x3] }
 0x19a   :  { %v539_v17 = vadd.f32 %v570_v15, %v531_v16 }
 0x19c   :  { %541 = vst.msk [vmem:[#allocation8] sm:$0x3] %vm47_vm2, %v539_v17 }
 0x19d   :  { %657 = shalt.err (!%p654_p6)
}
 0x19e   :  { %s658_s20 = scalar_lea.hbm %s769_s3, 32 }
 0x19f   :  { %p659_p7 = scmp.ne.s32.totalorder %s769_s3, %s658_s20  ;;  %p662_p8 = scmp.lt.u32.totalorder %s658_s20, %s769_s3 }
 0x1a1   :  { %p664_p9 = pnand %p662_p8, %p659_p7 }
 0x1a3   :  { %667 = shalt.err (!%p664_p9)
}
 0x1a4   :  { %551 = dma.vmem_to_hbm [thread:$0]  %s549_s16, 32, %s769_s3, [#allocation5]  }
 0x1a5   :  { %672 = dma.done.wait [#allocation5], 32  }
 0x1a6   :  { %673 = vsyncadd [#allocation5], 4294967264 }
 0x1a7   :  { %555 = vsyncpa [#allocation4], 1 }
 0x1a8   :  { %556 = vsyncpa [#allocation7], 1 }
 0x1a9   :  { %557 = vsyncpa [#allocation5], 1 }

</bundles_post_ra>
